<compile_context>
chip_gen: v6e
topology: v6e:2x2x1
jax: 0.10.0
libtpu: 0.0.40
codegen_flags: <defaults>
</compile_context>

<pallas_src>
import functools

import jax
import jax.numpy as jnp
from jax.experimental import pallas as pl
from jax.experimental.pallas import tpu as pltpu


# ---------------------------------------------------------------------------
# Pass 1: global average pool (tiled HW reduction, f32 accumulator)
# ---------------------------------------------------------------------------
def _pool_kernel(x_ref, sum_ref, acc_ref):
    # x_ref: (1, C, T_HW)   sum_ref: (1, C, 1) f32   acc_ref: (C, 1) f32
    t = pl.program_id(1)

    @pl.when(t == 0)
    def _():
        acc_ref[...] = jnp.zeros_like(acc_ref)

    x = x_ref[0].astype(jnp.float32)                     # (C, T_HW), f32 accum
    acc_ref[...] += jnp.sum(x, axis=1, keepdims=True)    # (C, 1)

    @pl.when(t == pl.num_programs(1) - 1)
    def _():
        sum_ref[0] = acc_ref[...]


# ---------------------------------------------------------------------------
# Pass 2: streaming channel-wise scale  out = x * gate  (gate tiny, resident)
# ---------------------------------------------------------------------------
def _scale_kernel(x_ref, g_ref, o_ref):
    # x_ref: (1, C, T_HW)   g_ref: (1, C, 1) f32   o_ref: (1, C, T_HW)
    x = x_ref[0].astype(jnp.float32)
    o_ref[0] = (x * g_ref[0]).astype(o_ref.dtype)


# ---------------------------------------------------------------------------
# Tiling / VMEM sizing helpers
# ---------------------------------------------------------------------------
def _pick_hw_tile(C, HW, elem_bytes, target_bytes=4 << 20):
    """Largest HW tile that is a multiple of 128, divides HW, and keeps the
    x tile under ~target_bytes.  Falls back to full extent if HW % 128 != 0."""
    if HW % 128 != 0:
        return HW
    max_lanes = max(128, ((target_bytes // (C * elem_bytes)) // 128) * 128)
    t = min(HW, max_lanes)
    while HW % t != 0:
        t -= 128
    return t


def _vmem_limit_bytes(C, t_hw, elem_bytes):
    # in-tile + out-tile, double buffered, plus headroom for gate/scratch.
    tile = C * t_hw * elem_bytes
    need = 2 * 2 * tile + (4 << 20)
    # Raise above the 16/32 MiB scoped defaults; cap well under v7x's 64 MiB.
    return int(min(max(need, 32 << 20), 48 << 20))


# ---------------------------------------------------------------------------
# Forward wrapper
# ---------------------------------------------------------------------------
@functools.partial(jax.jit, static_argnames=("hw_tile",))
def gab_forward(x_nchw, w1, b1, w2, b2, hw_tile=None):
    """out = x * sigmoid(W2 @ relu(W1 @ mean_hw(x) + b1) + b2), broadcast
    over H, W.  x_nchw: (N, C, H, W); w1: (Cr, C); b1: (Cr,); w2: (C, Cr);
    b2: (C,).  Pass bf16 x for ~2x less HBM traffic (math stays f32)."""
    N, C, H, W = x_nchw.shape
    HW = H * W
    elem_bytes = jnp.dtype(x_nchw.dtype).itemsize

    t_hw = hw_tile if hw_tile is not None else _pick_hw_tile(C, HW, elem_bytes)
    assert HW % t_hw == 0, "hw_tile must divide H*W"
    n_hw = HW // t_hw
    vmem_limit = _vmem_limit_bytes(C, t_hw, elem_bytes)

    x = x_nchw.reshape(N, C, HW)

    # ---- pass 1: pooled sums (N, C, 1), f32 --------------------------------
    sums = pl.pallas_call(
        _pool_kernel,
        out_shape=jax.ShapeDtypeStruct((N, C, 1), jnp.float32),
        grid_spec=pltpu.PrefetchScalarGridSpec(
            num_scalar_prefetch=0,
            grid=(N, n_hw),
            in_specs=[pl.BlockSpec((1, C, t_hw), lambda b, t: (b, 0, t))],
            out_specs=pl.BlockSpec((1, C, 1), lambda b, t: (b, 0, 0)),
            scratch_shapes=[pltpu.VMEM((C, 1), jnp.float32)],
        ),
        compiler_params=pltpu.CompilerParams(
            dimension_semantics=("parallel", "arbitrary"),
            vmem_limit_bytes=vmem_limit,
        ),
    )(x)

    # ---- tiny MLP + sigmoid gate in plain JAX (off the hot path) -----------
    mean = sums[:, :, 0] * (1.0 / HW)                                   # (N, C)
    h = jnp.maximum(mean @ w1.T.astype(jnp.float32)
                    + b1.astype(jnp.float32), 0.0)                      # (N, Cr)
    gate = jax.nn.sigmoid(h @ w2.T.astype(jnp.float32)
                          + b2.astype(jnp.float32))                     # (N, C)
    gate = gate[:, :, None]                                             # (N, C, 1)

    # ---- pass 2: streaming scale -------------------------------------------
    out = pl.pallas_call(
        _scale_kernel,
        out_shape=jax.ShapeDtypeStruct((N, C, HW), x.dtype),
        grid_spec=pltpu.PrefetchScalarGridSpec(
            num_scalar_prefetch=0,
            grid=(N, n_hw),
            in_specs=[
                pl.BlockSpec((1, C, t_hw), lambda b, t: (b, 0, t)),
                pl.BlockSpec((1, C, 1), lambda b, t: (b, 0, 0)),
            ],
            out_specs=pl.BlockSpec((1, C, t_hw), lambda b, t: (b, 0, t)),
        ),
        compiler_params=pltpu.CompilerParams(
            dimension_semantics=("parallel", "parallel"),
            vmem_limit_bytes=vmem_limit,
        ),
        # NOTE: input_output_aliases={0: 0} (donating x) is a free HBM-capacity
        # win when the caller donates x; omitted here because the test reuses x.
    )(x, gate)

    return out.reshape(N, C, H, W)


def gab_reference(x, w1, b1, w2, b2):
    """Plain-JAX reference mirroring the PyTorch gate block."""
    xf = x.astype(jnp.float32)
    z = jnp.mean(xf, axis=(2, 3))                        # (N, C)
    h = jnp.maximum(z @ w1.T + b1, 0.0)                  # (N, Cr)
    g = jax.nn.sigmoid(h @ w2.T + b2)                    # (N, C)
    return xf * g[:, :, None, None]


# TODO(synk): the rest of UnetOverResnet34Class (ResNet34 encoder, 3x3
# Conv+BN+PReLU decoder blocks, maxpool, bilinear upsample, dropout, linear
# heads) is standard conv/linear work best left to XLA; only the
# pool->MLP->sigmoid->scale gate pattern is hand-written here.

if __name__ == "__main__":
    # Small shapes consistent with the module: N=2, C=8 (reduction=4 -> Cr=2),
    # H=W=16.  hw_tile=128 forces the multi-tile pipeline (HW=256 -> 2 tiles).
    N, C, H, W = 2, 8, 16, 16
    reduction = 4
    Cr = C // reduction

    key = jax.random.PRNGKey(0)
    kx, k1, kb1, k2, kb2 = jax.random.split(key, 5)

    x = jax.random.normal(kx, (N, C, H, W), dtype=jnp.float32)
    w1 = jax.random.normal(k1, (Cr, C), dtype=jnp.float32) * 0.1   # 1x1 conv C->Cr
    b1 = jax.random.normal(kb1, (Cr,), dtype=jnp.float32) * 0.1
    w2 = jax.random.normal(k2, (C, Cr), dtype=jnp.float32) * 0.1   # 1x1 conv Cr->C
    b2 = jax.random.normal(kb2, (C,), dtype=jnp.float32) * 0.1

    # f32 streaming path.
    out = jax.block_until_ready(gab_forward(x, w1, b1, w2, b2, hw_tile=128))
    ref = gab_reference(x, w1, b1, w2, b2)
    assert out.shape == (N, C, H, W)
    assert jnp.allclose(out, ref, atol=1e-5, rtol=1e-5), "f32 mismatch vs reference"

    # bf16 streaming path (halves HBM traffic; accumulation / gating stays f32).
    x_bf16 = x.astype(jnp.bfloat16)
    out_bf = jax.block_until_ready(gab_forward(x_bf16, w1, b1, w2, b2, hw_tile=128))
    ref_bf = gab_reference(x_bf16.astype(jnp.float32), w1, b1, w2, b2)
    assert out_bf.dtype == jnp.bfloat16
    assert jnp.allclose(out_bf.astype(jnp.float32), ref_bf, atol=2e-2, rtol=2e-2), \
        "bf16 mismatch vs reference"

    print("KERNEL_OK")
</pallas_src>

<mosaic_0001>
module attributes {stable_mosaic.version = 11 : i64} {
  func.func @_pool_kernel(%arg0: i32, %arg1: i32, %arg2: memref<1x8x128xf32, #tpu.memory_space<vmem>>, %arg3: memref<1x8x1xf32, #tpu.memory_space<vmem>>, %arg4: memref<8x1xf32, #tpu.memory_space<vmem>>) attributes {dimension_semantics = [#tpu.dimension_semantics<parallel>, #tpu.dimension_semantics<arbitrary>], iteration_bounds = array<i64: 2, 2>, scalar_prefetch = 0 : i64, scratch_operands = 1 : i64, tpu.core_type = #tpu.core_type<tc>, window_params = [{transform_indices = @transform_0, window_bounds = array<i64: 1, 8, 128>}, {transform_indices = @transform_1, window_bounds = array<i64: 1, 8, 1>}]} {
    %c0_i32 = arith.constant 0 : i32
    %0 = arith.cmpi eq, %arg1, %c0_i32 : i32
    %1 = arith.extui %0 : i1 to i32
    %c0_i32_0 = arith.constant 0 : i32
    %2 = arith.cmpi ne, %1, %c0_i32_0 : i32
    scf.if %2 {
      %cst_8 = arith.constant 0.000000e+00 : f32
      %13 = vector.broadcast %cst_8 : f32 to vector<8x1xf32>
      %c0_9 = arith.constant 0 : index
      %c0_10 = arith.constant 0 : index
      %14 = vector.load %arg4[%c0_9, %c0_10] : memref<8x1xf32, #tpu.memory_space<vmem>>, vector<8x1xf32>
      tpu.vector_store %arg4[%c0_9, %c0_10], %13 {strides = array<i32>} : memref<8x1xf32, #tpu.memory_space<vmem>>, vector<8x1xf32>,
    } else {
    }
    %c0 = arith.constant 0 : index
    %c0_1 = arith.constant 0 : index
    %c0_2 = arith.constant 0 : index
    %3 = vector.load %arg2[%c0, %c0_1, %c0_2] : memref<1x8x128xf32, #tpu.memory_space<vmem>>, vector<1x8x128xf32>
    %4 = vector.shape_cast %3 : vector<1x8x128xf32> to vector<8x128xf32>
    %c0_3 = arith.constant 0 : index
    %c0_4 = arith.constant 0 : index
    %5 = vector.load %arg4[%c0_3, %c0_4] : memref<8x1xf32, #tpu.memory_space<vmem>>, vector<8x1xf32>
    %cst = arith.constant dense<0.000000e+00> : vector<8xf32>
    %6 = vector.multi_reduction <add>, %4, %cst [1] : vector<8x128xf32> to vector<8xf32>
    %7 = vector.shape_cast %6 : vector<8xf32> to vector<8x1xf32>
    %8 = arith.addf %5, %7 : vector<8x1xf32>
    %c0_5 = arith.constant 0 : index
    %c0_6 = arith.constant 0 : index
    %9 = vector.load %arg4[%c0_5, %c0_6] : memref<8x1xf32, #tpu.memory_space<vmem>>, vector<8x1xf32>
    tpu.vector_store %arg4[%c0_5, %c0_6], %8 {strides = array<i32>} : memref<8x1xf32, #tpu.memory_space<vmem>>, vector<8x1xf32>,
    %c1_i32 = arith.constant 1 : i32
    %10 = arith.cmpi eq, %arg1, %c1_i32 : i32
    %11 = arith.extui %10 : i1 to i32
    %c0_i32_7 = arith.constant 0 : i32
    %12 = arith.cmpi ne, %11, %c0_i32_7 : i32
    scf.if %12 {
      %c0_8 = arith.constant 0 : index
      %c0_9 = arith.constant 0 : index
      %13 = vector.load %arg4[%c0_8, %c0_9] : memref<8x1xf32, #tpu.memory_space<vmem>>, vector<8x1xf32>
      %c0_10 = arith.constant 0 : index
      %c0_11 = arith.constant 0 : index
      %c0_12 = arith.constant 0 : index
      %14 = vector.load %arg3[%c0_10, %c0_11, %c0_12] : memref<1x8x1xf32, #tpu.memory_space<vmem>>, vector<1x8x1xf32>
      %15 = vector.shape_cast %14 : vector<1x8x1xf32> to vector<8x1xf32>
      %16 = vector.shape_cast %13 : vector<8x1xf32> to vector<1x8x1xf32>
      tpu.vector_store %arg3[%c0_10, %c0_11, %c0_12], %16 {strides = array<i32>} : memref<1x8x1xf32, #tpu.memory_space<vmem>>, vector<1x8x1xf32>,
    } else {
    }
    return
  }
  func.func @transform_0(%arg0: i32, %arg1: i32) -> (i32, i32, i32) {
    %c0_i32 = arith.constant 0 : i32
    %c0_i32_0 = arith.constant 0 : i32
    return %arg0, %c0_i32, %arg1 : i32, i32, i32
  }
  func.func @transform_1(%arg0: i32, %arg1: i32) -> (i32, i32, i32) {
    %c0_i32 = arith.constant 0 : i32
    %c0_i32_0 = arith.constant 0 : i32
    %c0_i32_1 = arith.constant 0 : i32
    return %arg0, %c0_i32, %c0_i32_0 : i32, i32, i32
  }
}

module attributes {stable_mosaic.version = 11 : i64} {
  func.func @_scale_kernel(%arg0: i32, %arg1: i32, %arg2: memref<1x8x128xf32, #tpu.memory_space<vmem>>, %arg3: memref<1x8x1xf32, #tpu.memory_space<vmem>>, %arg4: memref<1x8x128xf32, #tpu.memory_space<vmem>>) attributes {dimension_semantics = [#tpu.dimension_semantics<parallel>, #tpu.dimension_semantics<parallel>], iteration_bounds = array<i64: 2, 2>, scalar_prefetch = 0 : i64, scratch_operands = 0 : i64, tpu.core_type = #tpu.core_type<tc>, window_params = [{transform_indices = @transform_0, window_bounds = array<i64: 1, 8, 128>}, {transform_indices = @transform_1, window_bounds = array<i64: 1, 8, 1>}, {transform_indices = @transform_2, window_bounds = array<i64: 1, 8, 128>}]} {
    %c0 = arith.constant 0 : index
    %c0_0 = arith.constant 0 : index
    %c0_1 = arith.constant 0 : index
    %0 = vector.load %arg2[%c0, %c0_0, %c0_1] : memref<1x8x128xf32, #tpu.memory_space<vmem>>, vector<1x8x128xf32>
    %1 = vector.shape_cast %0 : vector<1x8x128xf32> to vector<8x128xf32>
    %c0_2 = arith.constant 0 : index
    %c0_3 = arith.constant 0 : index
    %c0_4 = arith.constant 0 : index
    %2 = vector.load %arg3[%c0_2, %c0_3, %c0_4] : memref<1x8x1xf32, #tpu.memory_space<vmem>>, vector<1x8x1xf32>
    %3 = vector.shape_cast %2 : vector<1x8x1xf32> to vector<8x1xf32>
    %4 = vector.broadcast %3 : vector<8x1xf32> to vector<8x128xf32>
    %5 = arith.mulf %1, %4 : vector<8x128xf32>
    %c0_5 = arith.constant 0 : index
    %c0_6 = arith.constant 0 : index
    %c0_7 = arith.constant 0 : index
    %6 = vector.load %arg4[%c0_5, %c0_6, %c0_7] : memref<1x8x128xf32, #tpu.memory_space<vmem>>, vector<1x8x128xf32>
    %7 = vector.shape_cast %6 : vector<1x8x128xf32> to vector<8x128xf32>
    %8 = vector.shape_cast %5 : vector<8x128xf32> to vector<1x8x128xf32>
    tpu.vector_store %arg4[%c0_5, %c0_6, %c0_7], %8 {strides = array<i32>} : memref<1x8x128xf32, #tpu.memory_space<vmem>>, vector<1x8x128xf32>,
    return
  }
  func.func @transform_0(%arg0: i32, %arg1: i32) -> (i32, i32, i32) {
    %c0_i32 = arith.constant 0 : i32
    %c0_i32_0 = arith.constant 0 : i32
    return %arg0, %c0_i32, %arg1 : i32, i32, i32
  }
  func.func @transform_1(%arg0: i32, %arg1: i32) -> (i32, i32, i32) {
    %c0_i32 = arith.constant 0 : i32
    %c0_i32_0 = arith.constant 0 : i32
    %c0_i32_1 = arith.constant 0 : i32
    return %arg0, %c0_i32, %c0_i32_0 : i32, i32, i32
  }
  func.func @transform_2(%arg0: i32, %arg1: i32) -> (i32, i32, i32) {
    %c0_i32 = arith.constant 0 : i32
    %c0_i32_0 = arith.constant 0 : i32
    return %arg0, %c0_i32, %arg1 : i32, i32, i32
  }
}

</mosaic_0001>

<bundles_post_ra>
// kernel: gab_forward.2
= control target key start
LH: loop header
LB: loop body
LE: loop exit
PB: predicated region body
PF: predicated region fallthrough
CT: control target
= control target key end

     0   :  { %s331_s6 = smov 0   ;;  %s333_s7 = smov 0   ;;  %s388_s0 = inlined_call_operand.vmem [shape: f32[2,8,256], index: 0, kind: input, shape index: {}]   ;;  %s389_s1 = inlined_call_operand.vmem [shape: f32[2,8,1], index: 1, kind: output, shape index: {}]  }
   0x1   :  { %s335_s8 = smov 0   ;;  %s337_s9 = smov 0  }
   0x2   :  { %s339_s10 = smov 0  }
   0x3 LB: > { %s20_s11 = sadd.s32 1, %s310_s8  ;;  %s23_s12 = sadd.s32 1, %s314_s9  ;;  %s318_s10 = sphi %s339_s10, %s11_s10   ;;  %s314_s9 = sphi %s337_s9, %s393_s9   ;;  %s310_s8 = sphi %s335_s8, %s392_s8   ;;  %s306_s7 = sphi %s333_s7, %s391_s7   ;;  %s302_s6 = sphi %s331_s6, %s390_s6  }
   0x4   : > { %p21_p0 = scmp.ge.s32.totalorder %s20_s11, 2  ;;  %p231_p1 = scmp.ge.s32.totalorder %s318_s10, 1 }
   0x5   : > { %p104_p2 = scmp.lt.s32.totalorder %s318_s10, 5 }
   0x6   : > { %s395_s11 = smov (%p21_p0, %s20_s11), 0  ;;  %s397_s12 = smov (!%p21_p0, %s23_s12), %s314_s9 }
   0x7   : > { %p105_p3 = pnand %p231_p1, %p104_p2  ;;  %p25_p4 = scmp.ge.s32.totalorder %s397_s12, 2 }
   0x8   : > { %p126_p5 = scmp.lt.s32.totalorder (!%p105_p3), %s306_s7, 1  ;;  %p128_p6 = scmp.lt.s32.totalorder (!%p105_p3), %s302_s6, 1 }
   0x9   : > { %s399_s12 = smov (%p25_p4, %s397_s12), 0  ;;  %108 = sbr.rel (%p105_p3) target bundleno = 175 (0xaf), region = 24 }
   0xa   : > { %p235_p7 = scmp.ne.s32.totalorder (!%p105_p3), %s302_s6, 0 }
   0xe   : > { %s401_s7 = smov (!%p126_p5, %s306_s7), 1 }
   0xf   : > { %s129_s13 = scalar_select %p128_p6, %s302_s6, 1 }
  0x10   : > { %s232_s14 = sshll.u32 %s401_s7, 1  ;;  %s234_s15 = sshll.u32 %s401_s7, 3 }
  0x11   : > { %s131_s16 = sadd.s32 %s232_s14, %s129_s13  ;;  %s137_s19 = scalar_lea.vmem %s389_s1, %s234_s15 }
  0x12   : > { %s233_s20 = sshll.u32 %s131_s16, 3  ;;  %141 = sbr.rel (%p235_p7) target bundleno = 25 (0x19), region = 28 }
  0x13   : > { %s133_s23 = scalar_lea.vmem %s388_s0, %s233_s20 }
  0x17   : > { %vm142_vm0 = vcmask 7168   ;;  %v320_v0 = vmov 0.0  }
  0x18   : > { %143 = vst.msk [vmem:[#allocation2] sm:$0xff] %vm142_vm0, %v320_v0 }
  0x19 PF: > { %v144_v1 = vld [vmem:[%s133_s23] sm:$0xff]  ;;  %vm149_vm1 = vcmask 7168   ;;  %p236_p8 = scmp.ne.s32.totalorder %s302_s6, 1 }
  0x1a   : > { %146 = vadd.xlane.f32.xlu0 %v144_v1 }
  0x1f   : > { %v145_v2 = vld [vmem:[#allocation2] sm:$0xff] }
  0xa2   : > { %154 = sbr.rel (%p236_p8) target bundleno = 175 (0xaf), region = 32 }
  0xa3   : > { %v147_v3 = vpop.xlane.xlu0 %146 }
  0xa4   : > { %v148_v4 = vadd.f32 %v147_v3, %v145_v2 }
  0xa6   : > { %150 = vst.msk [vmem:[#allocation2] sm:$0xff] %vm149_vm1, %v148_v4 }
  0xad   : > { %v155_v5 = vld [vmem:[#allocation2] sm:$0xff] }
  0xae   : > { %156 = vst.msk [vmem:[%s137_s19] sm:$0xff] %vm149_vm1, %v155_v5 }
  0xaf PF: > { %s11_s10 = sadd.s32 1, %s318_s10   ;;  %s390_s6 = smov %s310_s8 }
  0xb0   : > { %p8_p9 = scmp.ge.s32.totalorder %s11_s10, 6   ;;  %s391_s7 = smov %s314_s9 }
  0xb1   : > { %s392_s8 = smov %s395_s11  ;;  %s393_s9 = smov %s399_s12 }
  0xb2   :  { %10 = sbr.rel (!%p8_p9) target bundleno = 3 (0x3), region = 62 }

// kernel: gab_forward.3
= control target key start
LH: loop header
LB: loop body
LE: loop exit
PB: predicated region body
PF: predicated region fallthrough
CT: control target
= control target key end

     0   :  { %s409_s9 = smov 0   ;;  %s411_s10 = smov 0   ;;  %s460_s0 = inlined_call_operand.vmem [shape: f32[2,8,256], index: 0, kind: input, shape index: {}]   ;;  %s461_s1 = inlined_call_operand.vmem [shape: f32[2,8,1], index: 1, kind: input, shape index: {}]   ;;  %s462_s2 = inlined_call_operand.vmem [shape: f32[2,8,256], index: 2, kind: output, shape index: {}]  }
   0x1   :  { %s413_s11 = smov 0   ;;  %s415_s12 = smov 0  }
   0x2   :  { %s417_s13 = smov 0  }
   0x3 LB: > { %s21_s14 = sadd.s32 1, %s383_s11  ;;  %s24_s15 = sadd.s32 1, %s387_s12  ;;  %s391_s13 = sphi %s417_s13, %s12_s13   ;;  %s387_s12 = sphi %s415_s12, %s466_s12   ;;  %s383_s11 = sphi %s413_s11, %s465_s11   ;;  %s379_s10 = sphi %s411_s10, %s464_s10   ;;  %s375_s9 = sphi %s409_s9, %s463_s9  }
   0x4   : > { %p22_p0 = scmp.ge.s32.totalorder %s21_s14, 2  ;;  %p303_p1 = scmp.ge.s32.totalorder %s391_s13, 1 }
   0x5   : > { %p140_p2 = scmp.lt.s32.totalorder %s391_s13, 5 }
   0x6   : > { %s468_s14 = smov (%p22_p0, %s21_s14), 0  ;;  %s470_s15 = smov (!%p22_p0, %s24_s15), %s387_s12 }
   0x7   : > { %p141_p3 = pnand %p303_p1, %p140_p2  ;;  %p26_p4 = scmp.ge.s32.totalorder %s470_s15, 2 }
   0x8   : > { %p172_p5 = scmp.lt.s32.totalorder (!%p141_p3), %s379_s10, 1  ;;  %p174_p6 = scmp.lt.s32.totalorder (!%p141_p3), %s375_s9, 1 }
   0x9   : > { %s472_s15 = smov (%p26_p4, %s470_s15), 0  ;;  %144 = sbr.rel (%p141_p3) target bundleno = 145 (0x91), region = 28 }
   0xe   : > { %v393_v0 = vmov 0   ;;  %s474_s10 = smov (!%p172_p5, %s379_s10), 1  ;;  %s476_s9 = smov (!%p174_p6, %s375_s9), 1 }
   0xf   : > { %352 = vset.pattern.permute.xlu0 %v393_v0  ;;  %s306_s16 = sshll.u32 %s474_s10, 3  ;;  %s304_s20 = sshll.u32 %s474_s10, 1 }
  0x10   : > { %s183_s19 = scalar_lea.vmem %s461_s1, %s306_s16  ;;  %s177_s21 = sadd.s32 %s304_s20, %s476_s9 }
  0x11   : > { %v193_v1 = vld [vmem:[%s183_s19] sm:$0xff]  ;;  %s305_s22 = sshll.u32 %s177_s21, 3 }
  0x12   : > { %196 = vperm.xlu0 %352, %v193_v1   ;;  %s179_s25 = scalar_lea.vmem %s460_s0, %s305_s22  ;;  %s191_s28 = scalar_lea.vmem %s462_s2, %s305_s22 }
  0x13   : > { %v192_v2 = vld [vmem:[%s179_s25] sm:$0xff] }
  0x8d   : > { %v197_v3 = vpop.permute.xlu0 %196 }
  0x8e   : > { %v199_v4 = vmul.f32 %v197_v3, %v192_v2 }
  0x90   : > { %200 = vst [vmem:[%s191_s28] sm:$0xff] %v199_v4 }
  0x91 PF: > { %s12_s13 = sadd.s32 1, %s391_s13   ;;  %s463_s9 = smov %s383_s11 }
  0x92   : > { %p9_p7 = scmp.ge.s32.totalorder %s12_s13, 6   ;;  %s464_s10 = smov %s387_s12 }
  0x93   : > { %s465_s11 = smov %s468_s14  ;;  %s466_s12 = smov %s472_s15 }
  0x94   :  { %11 = sbr.rel (!%p9_p7) target bundleno = 3 (0x3), region = 61 }

</bundles_post_ra>
